<compile_context>
chip_gen: v5e
topology: v5e:2x2
jax: 0.10.0
libtpu: 0.0.40
codegen_flags: <defaults>
</compile_context>

<pallas_src>
import jax
import jax.numpy as jnp
from jax.experimental import pallas as pl
from jax.experimental.pallas import tpu as pltpu


def _osg_decoder_kernel(x_ref, w1_ref, b1_ref, w2_ref, b2_ref, out_ref):
    # x_ref: (K, TM, C) block of features for one item n.  The mean over the
    # K planes is a sum here; the 1/K factor is pre-folded into w1.
    K = x_ref.shape[0]
    # Per-plane accumulate: avoids materializing a full lane-padded f32 copy
    # of the whole (K, TM, C) block before the reduction.
    feat = x_ref[0].astype(jnp.float32)
    for k in range(1, K):
        feat = feat + x_ref[k].astype(jnp.float32)       # (TM, C) f32

    # Linear(C, 64) + Softplus (torch defaults: beta=1, threshold=20)
    h = jnp.dot(feat, w1_ref[...], preferred_element_type=jnp.float32) + b1_ref[...]
    h = jnp.where(h > 20.0, h, jnp.log1p(jnp.exp(jnp.minimum(h, 20.0))))

    # Linear(64, 1 + decoder_output_dim)
    y = jnp.dot(h, w2_ref[...], preferred_element_type=jnp.float32) + b2_ref[...]

    # Fused (TM, OUT) store: column 0 = raw sigma, columns 1: = sigmoid(y)*1.002 - 0.001.
    # Select via a column iota instead of narrow slices -> one full-width store.
    col = jax.lax.broadcasted_iota(jnp.int32, y.shape, 1)
    rgb_like = jax.nn.sigmoid(y) * (1.0 + 2.0 * 0.001) - 0.001
    out_ref[...] = jnp.where(col == 0, y, rgb_like).astype(out_ref.dtype)


def osg_decoder_forward(sampled_features, w1, b1, w2, b2, *,
                        max_tile_rows=None, min_grid_steps=8):
    """sampled_features: (N, K, M, C), f32 or bf16.
    Returns dict(rgb=(N, M, OUT-1), sigma=(N, M, 1)) in float32."""
    N, K, M, C = sampled_features.shape
    H = w1.shape[1]
    OUT = w2.shape[1]                                   # 1 + decoder_output_dim (= 4)
    itemsize = jnp.dtype(sampled_features.dtype).itemsize

    # ---- VMEM-aware tile selection -------------------------------------------------
    # Everything with a minor dim < 128 (C=32, H=64, OUT=4) lane-pads to 128 in VMEM,
    # so the true per-row footprint is ~4x the raw bytes.  Budget conservatively so
    # the same code fits v7x (64 MiB VMEM) while still using big tiles on v5e/v6e.
    try:
        vmem_physical = pltpu.get_tpu_info().vmem_capacity_bytes
    except Exception:
        vmem_physical = 64 << 20                        # conservative (v7x per-TC)
    vmem_budget = min(vmem_physical // 3, 40 << 20)

    # Per-row VMEM of one grid step (lane-padded to 128):
    #   features (double-buffered, K planes) + f32 feat/h/y intermediates
    #   + fused f32 output block (double-buffered).
    bytes_per_row = 2 * K * 128 * itemsize + 3 * 128 * 4 + 2 * 128 * 4
    vmem_cap_rows = max(8, int(vmem_budget) // bytes_per_row)

    # Keep the grid deep enough for double-buffering and v7x megacore sharding.
    blocks_per_n = max(1, -(-min_grid_steps // N))
    depth_cap_rows = -(-M // blocks_per_n)

    align = 16 if itemsize < 4 else 8                   # bf16 packs 16 rows/sublane tile
    tile_m = min(vmem_cap_rows, depth_cap_rows)
    if max_tile_rows is not None:
        tile_m = min(tile_m, int(max_tile_rows))
    if tile_m < M:
        tile_m = max(align, (tile_m // align) * align)
    if tile_m >= M:
        tile_m = M                                      # full-extent block is always legal

    # Partial last block: out-of-range input rows are garbage but rows are
    # independent and Pallas masks the out-of-range output writes.
    grid = (N, pl.cdiv(M, tile_m))

    # Fold the 1/K of the mean into w1; keep params in f32 (tiny, stays resident).
    w1_scaled = w1.astype(jnp.float32) / jnp.float32(K)
    b1_2d = b1.reshape(1, H).astype(jnp.float32)
    w2_f = w2.astype(jnp.float32)
    b2_2d = b2.reshape(1, OUT).astype(jnp.float32)

    points = N * M
    cost = pl.CostEstimate(
        flops=points * (K * C + 2 * C * H + 2 * H * OUT),
        transcendentals=points * (2 * H + OUT),
        bytes_accessed=(sampled_features.size * itemsize
                        + points * OUT * 4
                        + (C * H + H + H * OUT + OUT) * 4),
    )

    fused = pl.pallas_call(
        _osg_decoder_kernel,
        out_shape=jax.ShapeDtypeStruct((N, M, OUT), jnp.float32),
        grid_spec=pltpu.PrefetchScalarGridSpec(
            num_scalar_prefetch=0,
            grid=grid,
            in_specs=[
                # Original (N, K, M, C) layout: leading N dim squeezed (size-1
                # block); the kernel sees (K, tile_m, C).
                pl.BlockSpec((None, K, tile_m, C), lambda n, i: (n, 0, i, 0)),
                pl.BlockSpec((C, H), lambda n, i: (0, 0)),
                pl.BlockSpec((1, H), lambda n, i: (0, 0)),
                pl.BlockSpec((H, OUT), lambda n, i: (0, 0)),
                pl.BlockSpec((1, OUT), lambda n, i: (0, 0)),
            ],
            out_specs=pl.BlockSpec((None, tile_m, OUT), lambda n, i: (n, i, 0)),
        ),
        compiler_params=pltpu.CompilerParams(
            dimension_semantics=("parallel", "parallel"),
            vmem_limit_bytes=int(min(int(vmem_budget) + (16 << 20),
                                     int(vmem_physical) - (8 << 20))),
        ),
        cost_estimate=cost,
    )(sampled_features, w1_scaled, b1_2d, w2_f, b2_2d)

    return {"rgb": fused[..., 1:OUT], "sigma": fused[..., 0:1]}


def _reference_forward(sampled_features, w1, b1, w2, b2):
    """Pure-JAX reference mirroring the PyTorch module."""
    x = jnp.mean(sampled_features.astype(jnp.float32), axis=1)   # (N, M, C)
    N, M, C = x.shape
    x = x.reshape(N * M, C)
    h = x @ w1 + b1
    h = jnp.where(h > 20.0, h, jnp.log1p(jnp.exp(jnp.minimum(h, 20.0))))
    y = (h @ w2 + b2).reshape(N, M, -1)
    rgb = jax.nn.sigmoid(y[..., 1:]) * (1.0 + 2.0 * 0.001) - 0.001
    sigma = y[..., 0:1]
    return {"rgb": rgb, "sigma": sigma}


if __name__ == "__main__":
    # Small, deterministic example shapes:
    #   N=2 items, K=3 planes, C=32 features, hidden=64, decoder_output_dim=3.
    N, K, C = 2, 3, 32
    HIDDEN = 64
    DECODER_OUTPUT_DIM = 3
    OUT = 1 + DECODER_OUTPUT_DIM

    key = jax.random.PRNGKey(0)
    k_x, k_w1, k_b1, k_w2, k_b2 = jax.random.split(key, 5)

    # Deterministic parameter init (uniform, roughly matching nn.Linear scales).
    w1 = jax.random.uniform(k_w1, (C, HIDDEN), jnp.float32, -1.0, 1.0) / jnp.sqrt(C)
    b1 = jax.random.uniform(k_b1, (HIDDEN,), jnp.float32, -1.0, 1.0) / jnp.sqrt(C)
    w2 = jax.random.uniform(k_w2, (HIDDEN, OUT), jnp.float32, -1.0, 1.0) / jnp.sqrt(HIDDEN)
    b2 = jax.random.uniform(k_b2, (OUT,), jnp.float32, -1.0, 1.0) / jnp.sqrt(HIDDEN)

    # 1) f32 features, M divisible by the chosen tile (grid depth >= min_grid_steps).
    M = 256
    x32 = jax.random.normal(k_x, (N, K, M, C), dtype=jnp.float32)
    ref = _reference_forward(x32, w1, b1, w2, b2)
    out = osg_decoder_forward(x32, w1, b1, w2, b2)
    jax.block_until_ready(out)
    assert out["rgb"].shape == (N, M, 3)
    assert out["sigma"].shape == (N, M, 1)
    assert jnp.allclose(out["rgb"], ref["rgb"], atol=1e-5, rtol=1e-5)
    assert jnp.allclose(out["sigma"], ref["sigma"], atol=1e-5, rtol=1e-5)

    # 2) f32 features, M not divisible by the tile -> exercises the masked
    #    partial last block (no host-side padding copy anymore).
    M2 = 200
    x32b = jax.random.normal(k_x, (N, K, M2, C), dtype=jnp.float32)
    ref2 = _reference_forward(x32b, w1, b1, w2, b2)
    out2 = osg_decoder_forward(x32b, w1, b1, w2, b2)
    jax.block_until_ready(out2)
    assert out2["rgb"].shape == (N, M2, 3)
    assert jnp.allclose(out2["rgb"], ref2["rgb"], atol=1e-5, rtol=1e-5)
    assert jnp.allclose(out2["sigma"], ref2["sigma"], atol=1e-5, rtol=1e-5)

    # 3) bf16 features (halves input HBM traffic; kernel upcasts to f32).
    #    Reference uses the same bf16-quantized features so only kernel-side
    #    ordering/precision differs -> slightly loosened tolerance.
    x16 = x32.astype(jnp.bfloat16)
    ref3 = _reference_forward(x16.astype(jnp.float32), w1, b1, w2, b2)
    out3 = osg_decoder_forward(x16, w1, b1, w2, b2)
    jax.block_until_ready(out3)
    assert jnp.allclose(out3["rgb"], ref3["rgb"], atol=1e-4, rtol=1e-4)
    assert jnp.allclose(out3["sigma"], ref3["sigma"], atol=1e-4, rtol=1e-4)

    print("KERNEL_OK")
</pallas_src>

<mosaic_0001>
module attributes {stable_mosaic.version = 11 : i64} {
  func.func @_osg_decoder_kernel(%arg0: i32, %arg1: i32, %arg2: memref<1x3x64x32xf32, #tpu.memory_space<vmem>>, %arg3: memref<32x64xf32, #tpu.memory_space<vmem>>, %arg4: memref<1x64xf32, #tpu.memory_space<vmem>>, %arg5: memref<64x4xf32, #tpu.memory_space<vmem>>, %arg6: memref<1x4xf32, #tpu.memory_space<vmem>>, %arg7: memref<1x64x4xf32, #tpu.memory_space<vmem>>) attributes {dimension_semantics = [#tpu.dimension_semantics<parallel>, #tpu.dimension_semantics<parallel>], iteration_bounds = array<i64: 2, 4>, scalar_prefetch = 0 : i64, scratch_operands = 0 : i64, tpu.core_type = #tpu.core_type<tc>, window_params = [{transform_indices = @transform_0, window_bounds = array<i64: 1, 3, 64, 32>}, {pipeline_mode = #tpu.pipeline_mode<synchronous>, transform_indices = @transform_1, window_bounds = array<i64: 32, 64>}, {pipeline_mode = #tpu.pipeline_mode<synchronous>, transform_indices = @transform_2, window_bounds = array<i64: 1, 64>}, {pipeline_mode = #tpu.pipeline_mode<synchronous>, transform_indices = @transform_3, window_bounds = array<i64: 64, 4>}, {pipeline_mode = #tpu.pipeline_mode<synchronous>, transform_indices = @transform_4, window_bounds = array<i64: 1, 4>}, {transform_indices = @transform_5, window_bounds = array<i64: 1, 64, 4>}]} {
    %c0 = arith.constant 0 : index
    %c0_0 = arith.constant 0 : index
    %c0_1 = arith.constant 0 : index
    %c0_2 = arith.constant 0 : index
    %0 = vector.load %arg2[%c0, %c0_0, %c0_1, %c0_2] : memref<1x3x64x32xf32, #tpu.memory_space<vmem>>, vector<1x1x64x32xf32>
    %1 = vector.shape_cast %0 : vector<1x1x64x32xf32> to vector<64x32xf32>
    %c0_3 = arith.constant 0 : index
    %c1 = arith.constant 1 : index
    %c0_4 = arith.constant 0 : index
    %c0_5 = arith.constant 0 : index
    %2 = vector.load %arg2[%c0_3, %c1, %c0_4, %c0_5] : memref<1x3x64x32xf32, #tpu.memory_space<vmem>>, vector<1x1x64x32xf32>
    %3 = vector.shape_cast %2 : vector<1x1x64x32xf32> to vector<64x32xf32>
    %4 = arith.addf %1, %3 : vector<64x32xf32>
    %c0_6 = arith.constant 0 : index
    %c2 = arith.constant 2 : index
    %c0_7 = arith.constant 0 : index
    %c0_8 = arith.constant 0 : index
    %5 = vector.load %arg2[%c0_6, %c2, %c0_7, %c0_8] : memref<1x3x64x32xf32, #tpu.memory_space<vmem>>, vector<1x1x64x32xf32>
    %6 = vector.shape_cast %5 : vector<1x1x64x32xf32> to vector<64x32xf32>
    %7 = arith.addf %4, %6 : vector<64x32xf32>
    %c0_9 = arith.constant 0 : index
    %c0_10 = arith.constant 0 : index
    %8 = vector.load %arg3[%c0_9, %c0_10] : memref<32x64xf32, #tpu.memory_space<vmem>>, vector<32x64xf32>
    %cst = arith.constant dense<0.000000e+00> : vector<64x64xf32>
    %9 = tpu.matmul %7, %8, %cst {dimension_numbers = #tpu.dot_dimension_numbers<[1], [0], [0], [1], [0, 0, 1, 1], [], []>} : vector<64x32xf32>, vector<32x64xf32>, vector<64x64xf32> -> vector<64x64xf32>
    %c0_11 = arith.constant 0 : index
    %c0_12 = arith.constant 0 : index
    %10 = vector.load %arg4[%c0_11, %c0_12] : memref<1x64xf32, #tpu.memory_space<vmem>>, vector<1x64xf32>
    %11 = vector.broadcast %10 : vector<1x64xf32> to vector<64x64xf32>
    %12 = arith.addf %9, %11 : vector<64x64xf32>
    %cst_13 = arith.constant 2.000000e+01 : f32
    %13 = vector.broadcast %cst_13 : f32 to vector<64x64xf32>
    %14 = arith.cmpf ogt, %12, %13 : vector<64x64xf32>
    %cst_14 = arith.constant 2.000000e+01 : f32
    %15 = vector.broadcast %cst_14 : f32 to vector<64x64xf32>
    %16 = arith.minimumf %12, %15 : vector<64x64xf32>
    %17 = math.exp %16 : vector<64x64xf32>
    %18 = math.log1p %17 : vector<64x64xf32>
    %19 = arith.select %14, %12, %18 : vector<64x64xi1>, vector<64x64xf32>
    %c0_15 = arith.constant 0 : index
    %c0_16 = arith.constant 0 : index
    %20 = vector.load %arg5[%c0_15, %c0_16] : memref<64x4xf32, #tpu.memory_space<vmem>>, vector<64x4xf32>
    %cst_17 = arith.constant dense<0.000000e+00> : vector<64x4xf32>
    %21 = tpu.matmul %19, %20, %cst_17 {dimension_numbers = #tpu.dot_dimension_numbers<[1], [0], [0], [1], [0, 0, 1, 1], [], []>} : vector<64x64xf32>, vector<64x4xf32>, vector<64x4xf32> -> vector<64x4xf32>
    %c0_18 = arith.constant 0 : index
    %c0_19 = arith.constant 0 : index
    %22 = vector.load %arg6[%c0_18, %c0_19] : memref<1x4xf32, #tpu.memory_space<vmem>>, vector<1x4xf32>
    %23 = vector.broadcast %22 : vector<1x4xf32> to vector<64x4xf32>
    %24 = arith.addf %21, %23 : vector<64x4xf32>
    %25 = tpu.iota {dimensions = array<i32: 1>} : vector<64x4xi32>
    %26 = arith.negf %24 : vector<64x4xf32>
    %27 = math.exp %26 : vector<64x4xf32>
    %cst_20 = arith.constant 1.000000e+00 : f32
    %28 = vector.broadcast %cst_20 : f32 to vector<64x4xf32>
    %29 = arith.addf %28, %27 : vector<64x4xf32>
    %30 = arith.divf %28, %29 : vector<64x4xf32>
    %cst_21 = arith.constant 1.002000e+00 : f32
    %31 = vector.broadcast %cst_21 : f32 to vector<64x4xf32>
    %32 = arith.mulf %30, %31 : vector<64x4xf32>
    %cst_22 = arith.constant 1.000000e-03 : f32
    %33 = vector.broadcast %cst_22 : f32 to vector<64x4xf32>
    %34 = arith.subf %32, %33 : vector<64x4xf32>
    %c0_i32 = arith.constant 0 : i32
    %35 = vector.broadcast %c0_i32 : i32 to vector<64x4xi32>
    %36 = arith.cmpi eq, %25, %35 : vector<64x4xi32>
    %37 = arith.select %36, %24, %34 : vector<64x4xi1>, vector<64x4xf32>
    %c0_23 = arith.constant 0 : index
    %c0_24 = arith.constant 0 : index
    %c0_25 = arith.constant 0 : index
    %38 = vector.load %arg7[%c0_23, %c0_24, %c0_25] : memref<1x64x4xf32, #tpu.memory_space<vmem>>, vector<1x64x4xf32>
    %39 = vector.shape_cast %38 : vector<1x64x4xf32> to vector<64x4xf32>
    %40 = vector.shape_cast %37 : vector<64x4xf32> to vector<1x64x4xf32>
    tpu.vector_store %arg7[%c0_23, %c0_24, %c0_25], %40 {strides = array<i32>} : memref<1x64x4xf32, #tpu.memory_space<vmem>>, vector<1x64x4xf32>,
    return
  }
  func.func @transform_0(%arg0: i32, %arg1: i32) -> (i32, i32, i32, i32) {
    %c0_i32 = arith.constant 0 : i32
    %c0_i32_0 = arith.constant 0 : i32
    %c0_i32_1 = arith.constant 0 : i32
    return %arg0, %c0_i32, %arg1, %c0_i32_0 : i32, i32, i32, i32
  }
  func.func @transform_1(%arg0: i32, %arg1: i32) -> (i32, i32) {
    %c0_i32 = arith.constant 0 : i32
    %c0_i32_0 = arith.constant 0 : i32
    %c0_i32_1 = arith.constant 0 : i32
    return %c0_i32, %c0_i32_0 : i32, i32
  }
  func.func @transform_2(%arg0: i32, %arg1: i32) -> (i32, i32) {
    %c0_i32 = arith.constant 0 : i32
    %c0_i32_0 = arith.constant 0 : i32
    %c0_i32_1 = arith.constant 0 : i32
    return %c0_i32, %c0_i32_0 : i32, i32
  }
  func.func @transform_3(%arg0: i32, %arg1: i32) -> (i32, i32) {
    %c0_i32 = arith.constant 0 : i32
    %c0_i32_0 = arith.constant 0 : i32
    %c0_i32_1 = arith.constant 0 : i32
    return %c0_i32, %c0_i32_0 : i32, i32
  }
  func.func @transform_4(%arg0: i32, %arg1: i32) -> (i32, i32) {
    %c0_i32 = arith.constant 0 : i32
    %c0_i32_0 = arith.constant 0 : i32
    %c0_i32_1 = arith.constant 0 : i32
    return %c0_i32, %c0_i32_0 : i32, i32
  }
  func.func @transform_5(%arg0: i32, %arg1: i32) -> (i32, i32, i32) {
    %c0_i32 = arith.constant 0 : i32
    %c0_i32_0 = arith.constant 0 : i32
    return %arg0, %arg1, %c0_i32 : i32, i32, i32
  }
}

</mosaic_0001>

<bundles_post_ra>
// kernel: tpu_custom_call.1
= control target key start
LH: loop header
LB: loop body
LE: loop exit
PB: predicated region body
PF: predicated region fallthrough
CT: control target
= control target key end

     0   :  { %s1251_s18 = smov 0   ;;  %s1253_s19 = smov 0   ;;  %s1592_s0 = inlined_call_operand.vmem [shape: f32[2,3,256,32], index: 0, kind: input, shape index: {}]   ;;  %s1593_s1 = inlined_call_operand.vmem [shape: f32[32,64], index: 1, kind: input, shape index: {}]   ;;  %s1594_s2 = inlined_call_operand.vmem [shape: f32[1,64], index: 2, kind: input, shape index: {}]   ;;  %s1595_s3 = inlined_call_operand.vmem [shape: f32[64,4], index: 3, kind: input, shape index: {}]   ;;  %s1596_s4 = inlined_call_operand.vmem [shape: f32[1,4], index: 4, kind: input, shape index: {}]   ;;  %s1597_s5 = inlined_call_operand.vmem [shape: f32[2,256,4], index: 5, kind: output, shape index: {}]  }
   0x1   :  { %s1255_s20 = smov 0   ;;  %s1257_s21 = smov 0  }
   0x2   :  { %s1259_s22 = smov 0   ;;  %s1261_s23 = smov 0  }
   0x3   :  { %s1263_s24 = smov 0  }
   0x4 LB: > { %s24_s25 = sadd.s32 1, %s1211_s22  ;;  %s27_s26 = sadd.s32 1, %s1215_s23  ;;  %s1219_s24 = sphi %s1263_s24, %s15_s24   ;;  %s1215_s23 = sphi %s1261_s23, %s1603_s23   ;;  %s1211_s22 = sphi %s1259_s22, %s1602_s22   ;;  %s1207_s21 = sphi %s1257_s21, %s1601_s21   ;;  %s1203_s20 = sphi %s1255_s20, %s1600_s20   ;;  %s1199_s19 = sphi %s1253_s19, %s1599_s19   ;;  %s1195_s18 = sphi %s1251_s18, %s1598_s18  }
   0x5   : > { %p25_p0 = scmp.ge.s32.totalorder %s24_s25, 4  ;;  %p43_p1 = scmp.ne.s32.totalorder %s1199_s19, %s1195_s18 }
   0x6   : > { %p44_p2 = scmp.eq.s32.totalorder %s1219_s24, 0  ;;  %s36_s30 = sadd.s32 1, %s1199_s19 }
   0x7   : > { %s1605_s25 = smov (%p25_p0, %s24_s25), 0  ;;  %s1607_s26 = smov (!%p25_p0, %s27_s26), %s1215_s23 }
   0x8   : > { %p45_p3 = por %p44_p2, %p43_p1  ;;  %p29_p4 = scmp.ge.s32.totalorder %s1607_s26, 2 }
   0x9   : > { %s32_s27 = ssub.s32 %s1211_s22, %s1605_s25  ;;  %p971_p6 = scmp.ge.s32.totalorder %s1219_s24, 8 }
   0xa   : > { %s1609_s26 = smov (%p29_p4, %s1607_s26), 0 }
   0xb   : > { %s31_s28 = ssub.s32 %s1215_s23, %s1609_s26  ;;  %193 = sbr.rel (%p971_p6) target bundleno = 48 (0x30), region = 32 }
   0xc   : > { %s33_s29 = sor.u32 %s32_s27, %s31_s28 }
   0xd   : > { %p34_p5 = scmp.eq.s32.totalorder %s33_s29, 0 }
   0xf   : > { %s1302_s6 = scalar_select %p34_p5, %s1199_s19, %s36_s30  }
  0x10   : > { %196 = sbr.rel (!%p45_p3) target bundleno = 48 (0x30), region = 36  ;;  %s198_s7 = sand.u32 (%p45_p3), 1, %s1199_s19  }
  0x11   : > { %s1040_s8 = smul.u32 (%p45_p3), 192, %s198_s7  ;;  %s972_s9 = sshll.u32 (%p45_p3), %s1211_s22, 3 }
  0x12   : > { %s1041_s10 = smul.u32 (%p45_p3), 96, %s1215_s23 }
  0x13   : > { %s1316_s16 = scalar_lea.vmem (%p45_p3), [#allocation2], %s1040_s8 }
  0x14   : > { %s203_s11 = sadd.s32 (%p45_p3), %s1041_s10, %s972_s9 }
  0x15   : > { %s973_s12 = sshll.u32 %s203_s11, 3 }
  0x16   : > { %s1311_s15 = scalar_lea.vmem %s1592_s0, %s973_s12 }
  0x17   : > { %v280_v0 = vld [vmem:[%s1311_s15] sm:$0xff]  ;;  %v282_v1 = vld [vmem:[%s1311_s15 + $0x8] sm:$0xff]  ;;  %v284_v2 = vld [vmem:[%s1311_s15 + $0x10] sm:$0xff] }
  0x18   : > { %281 = vst [vmem:[%s1316_s16] sm:$0xff] %v280_v0  ;;  %v286_v3 = vld [vmem:[%s1311_s15 + $0x18] sm:$0xff]  ;;  %v288_v4 = vld [vmem:[%s1311_s15 + $0x20] sm:$0xff]  ;;  %v290_v5 = vld [vmem:[%s1311_s15 + $0x28] sm:$0xff] }
  0x19   : > { %283 = vst [vmem:[%s1316_s16 + $0x8] sm:$0xff] %v282_v1  ;;  %v292_v6 = vld [vmem:[%s1311_s15 + $0x30] sm:$0xff]  ;;  %v294_v7 = vld [vmem:[%s1311_s15 + $0x38] sm:$0xff]  ;;  %v296_v8 = vld [vmem:[%s1311_s15 + $0x100] sm:$0xff] }
  0x1a   : > { %285 = vst [vmem:[%s1316_s16 + $0x10] sm:$0xff] %v284_v2  ;;  %v298_v9 = vld [vmem:[%s1311_s15 + $0x108] sm:$0xff]  ;;  %v300_v10 = vld [vmem:[%s1311_s15 + $0x110] sm:$0xff]  ;;  %v302_v11 = vld [vmem:[%s1311_s15 + $0x118] sm:$0xff] }
  0x1b   : > { %287 = vst [vmem:[%s1316_s16 + $0x18] sm:$0xff] %v286_v3  ;;  %v304_v12 = vld [vmem:[%s1311_s15 + $0x120] sm:$0xff]  ;;  %v306_v13 = vld [vmem:[%s1311_s15 + $0x128] sm:$0xff]  ;;  %v308_v14 = vld [vmem:[%s1311_s15 + $0x130] sm:$0xff] }
  0x1c   : > { %289 = vst [vmem:[%s1316_s16 + $0x20] sm:$0xff] %v288_v4  ;;  %v310_v15 = vld [vmem:[%s1311_s15 + $0x138] sm:$0xff]  ;;  %v312_v16 = vld [vmem:[%s1311_s15 + $0x200] sm:$0xff]  ;;  %v314_v17 = vld [vmem:[%s1311_s15 + $0x208] sm:$0xff] }
  0x1d   : > { %291 = vst [vmem:[%s1316_s16 + $0x28] sm:$0xff] %v290_v5  ;;  %v316_v18 = vld [vmem:[%s1311_s15 + $0x210] sm:$0xff]  ;;  %v318_v19 = vld [vmem:[%s1311_s15 + $0x218] sm:$0xff]  ;;  %v320_v20 = vld [vmem:[%s1311_s15 + $0x220] sm:$0xff] }
  0x1e   : > { %293 = vst [vmem:[%s1316_s16 + $0x30] sm:$0xff] %v292_v6  ;;  %v322_v21 = vld [vmem:[%s1311_s15 + $0x228] sm:$0xff]  ;;  %v324_v22 = vld [vmem:[%s1311_s15 + $0x230] sm:$0xff]  ;;  %v326_v23 = vld [vmem:[%s1311_s15 + $0x238] sm:$0xff] }
  0x1f   : > { %295 = vst [vmem:[%s1316_s16 + $0x38] sm:$0xff] %v294_v7 }
  0x20   : > { %297 = vst [vmem:[%s1316_s16 + $0x40] sm:$0xff] %v296_v8 }
  0x21   : > { %299 = vst [vmem:[%s1316_s16 + $0x48] sm:$0xff] %v298_v9 }
  0x22   : > { %301 = vst [vmem:[%s1316_s16 + $0x50] sm:$0xff] %v300_v10 }
  0x23   : > { %303 = vst [vmem:[%s1316_s16 + $0x58] sm:$0xff] %v302_v11 }
  0x24   : > { %305 = vst [vmem:[%s1316_s16 + $0x60] sm:$0xff] %v304_v12 }
  0x25   : > { %307 = vst [vmem:[%s1316_s16 + $0x68] sm:$0xff] %v306_v13 }
  0x26   : > { %309 = vst [vmem:[%s1316_s16 + $0x70] sm:$0xff] %v308_v14 }
  0x27   : > { %311 = vst [vmem:[%s1316_s16 + $0x78] sm:$0xff] %v310_v15 }
  0x28   : > { %313 = vst [vmem:[%s1316_s16 + $0x80] sm:$0xff] %v312_v16 }
  0x29   : > { %315 = vst [vmem:[%s1316_s16 + $0x88] sm:$0xff] %v314_v17 }
  0x2a   : > { %317 = vst [vmem:[%s1316_s16 + $0x90] sm:$0xff] %v316_v18 }
  0x2b   : > { %319 = vst [vmem:[%s1316_s16 + $0x98] sm:$0xff] %v318_v19 }
  0x2c   : > { %321 = vst [vmem:[%s1316_s16 + $0xa0] sm:$0xff] %v320_v20 }
  0x2d   : > { %323 = vst [vmem:[%s1316_s16 + $0xa8] sm:$0xff] %v322_v21 }
  0x2e   : > { %325 = vst [vmem:[%s1316_s16 + $0xb0] sm:$0xff] %v324_v22 }
  0x2f   : > { %327 = vst [vmem:[%s1316_s16 + $0xb8] sm:$0xff] %v326_v23 }
  0x30 PF: > { %p974_p7 = scmp.ge.s32.totalorder %s1219_s24, 1  ;;  %p332_p8 = scmp.lt.s32.totalorder %s1219_s24, 9 }
  0x32   : > { %p333_p9 = pnand %p974_p7, %p332_p8 }
  0x33   : > { %s339_s30 = sand.u32 (!%p333_p9), 1, %s1195_s18   ;;  %s975_s16 = sshll.u32 (!%p333_p9), %s1203_s20, 3 }
  0x34   : > { %336 = sbr.rel (%p333_p9) target bundleno = 441 (0x1b9), region = 74  ;;  %p372_p10 = scmp.lt.s32.totalorder (!%p333_p9), %s1207_s21, 1 }
  0x35   : > { %s1042_s7 = smul.u32 (!%p333_p9), 192, %s339_s30  ;;  %p374_p11 = scmp.lt.s32.totalorder (!%p333_p9), %s975_s16, 31 }
  0x37   : > { %s1378_s12 = scalar_lea.vmem (!%p333_p9), [#allocation2], %s1042_s7 }
  0x39   : > { %v426_v24 = vld [vmem:[%s1593_s1 + $0x18] sm:$0xff]  ;;  %v425_v25 = vld [vmem:[%s1593_s1 + $0x10] sm:$0xff]  ;;  %v424_v26 = vld [vmem:[%s1593_s1 + $0x8] sm:$0xff]  ;;  %vm431_vm0 = vcmask 261120   ;;  %vm621_vm2 = vcmask 523264   ;;  %s1611_s21 = smov (!%p372_p10, %s1207_s21), 1 }
  0x3a   : > { %468 = vmatpush.msra.mxu0 %v426_v24  ;;  %1028 = vmatpush.msra.mxu3 %v426_v24  ;;  %v423_v27 = vld [vmem:[%s1593_s1] sm:$0xff]  ;;  %v382_v32 = vld [vmem:[%s1378_s12 + $0x8] sm:$0xff]  ;;  %v387_v39 = vld [vmem:[%s1378_s12 + $0x30] sm:$0xff]  ;;  %s1613_s16 = smov (!%p374_p11, %s975_s16), 31  ;;  %s976_s17 = sshll.u32 %s1611_s21, 5 }
  0x3b   : > { %v381_v28 = vld [vmem:[%s1378_s12] sm:$0xff]  ;;  %v979_v33 = vld [vmem:[%s1378_s12 + $0x48] sm:$0xff]  ;;  %v984_v40 = vld [vmem:[%s1378_s12 + $0x70] sm:$0xff]  ;;  %s377_s20 = sadd.s32 %s976_s17, %s1613_s16 }
  0x3c   : > { %469 = vmatpush.msra.mxu0 %v425_v25  ;;  %1029 = vmatpush.msra.mxu3 %v425_v25  ;;  %v978_v29 = vld [vmem:[%s1378_s12 + $0x40] sm:$0xff]  ;;  %v386_v34 = vld [vmem:[%s1378_s12 + $0x28] sm:$0xff]  ;;  %v399_v41 = vadd.f32 %v979_v33, %v382_v32  ;;  %v404_v44 = vadd.f32 %v984_v40, %v387_v39  ;;  %v992_v45 = vld [vmem:[%s1378_s12 + $0xb0] sm:$0xff]  ;;  %s977_s21 = sshll.u32 %s377_s20, 3 }
  0x3d   : > { %v986_v30 = vld [vmem:[%s1378_s12 + $0x80] sm:$0xff]  ;;  %v398_v31 = vadd.f32 %v978_v29, %v381_v28  ;;  %v983_v35 = vld [vmem:[%s1378_s12 + $0x68] sm:$0xff]  ;;  %v383_v47 = vld [vmem:[%s1378_s12 + $0x10] sm:$0xff]  ;;  %s1514_s29 = scalar_lea.vmem %s1597_s5, %s977_s21 }
  0x3e   : > { %470 = vmatpush.msra.mxu0 %v424_v26  ;;  %1030 = vmatpush.msra.mxu3 %v424_v26  ;;  %v991_v36 = vld [vmem:[%s1378_s12 + $0xa8] sm:$0xff]  ;;  %v403_v38 = vadd.f32 %v983_v35, %v386_v34  ;;  %v980_v48 = vld [vmem:[%s1378_s12 + $0x50] sm:$0xff]  ;;  %v421_v49 = vadd.f32 %v992_v45, %v404_v44  ;;  %v388_v50 = vld [vmem:[%s1378_s12 + $0x38] sm:$0xff] }
  0x3f   : > { %v415_v37 = vadd.f32 %v986_v30, %v398_v31  ;;  %v987_v43 = vld [vmem:[%s1378_s12 + $0x88] sm:$0xff]  ;;  %v985_v51 = vld [vmem:[%s1378_s12 + $0x78] sm:$0xff]  ;;  %v400_v52 = vadd.f32 %v980_v48, %v383_v47  ;;  %v988_v53 = vld [vmem:[%s1378_s12 + $0x90] sm:$0xff] }
  0x40   : > { %471 = vmatpush.msra.mxu0 %v423_v27  ;;  %1031 = vmatpush.msra.mxu3 %v423_v27  ;;  %v420_v42 = vadd.f32 %v991_v36, %v403_v38  ;;  %v416_v46 = vadd.f32 %v987_v43, %v399_v41  ;;  %v405_v54 = vadd.f32 %v985_v51, %v388_v50  ;;  %v993_v55 = vld [vmem:[%s1378_s12 + $0xb8] sm:$0xff]  ;;  %v385_v63 = vld [vmem:[%s1378_s12 + $0x20] sm:$0xff]  ;;  %v615_v5 = vld [vmem:[%s1595_s3 + $0x30] sm:$0xff] }
  0x41   : > { %994 = vmatmul.msk.f32.vlgmr.msra.gmra.mxu0 %vm431_vm0, %v415_v37  ;;  %v417_v56 = vadd.f32 %v988_v53, %v400_v52  ;;  %v384_v57 = vld [vmem:[%s1378_s12 + $0x18] sm:$0xff]  ;;  %v982_v0 = vld [vmem:[%s1378_s12 + $0x60] sm:$0xff]  ;;  %v614_v6 = vld [vmem:[%s1595_s3 + $0x28] sm:$0xff] }
  0x42   : > { %999 = vmatmul.msk.f32.vlgmr.msra.gmra.mxu3 %vm431_vm0, %v420_v42  ;;  %v981_v58 = vld [vmem:[%s1378_s12 + $0x58] sm:$0xff]  ;;  %v422_v59 = vadd.f32 %v993_v55, %v405_v54  ;;  %v402_v1 = vadd.f32 %v982_v0, %v385_v63  ;;  %v990_v2 = vld [vmem:[%s1378_s12 + $0xa0] sm:$0xff]  ;;  %v611_v9 = vld [vmem:[%s1595_s3 + $0x10] sm:$0xff] }
  0x43   : > { %v401_v60 = vadd.f32 %v981_v58, %v384_v57  ;;  %v989_v61 = vld [vmem:[%s1378_s12 + $0x98] sm:$0xff]  ;;  %v613_v7 = vld [vmem:[%s1595_s3 + $0x20] sm:$0xff]  ;;  %v610_v10 = vld [vmem:[%s1595_s3 + $0x8] sm:$0xff] }
  0x44   : > { %v419_v3 = vadd.f32 %v990_v2, %v402_v1  ;;  %v616_v4 = vld [vmem:[%s1595_s3 + $0x38] sm:$0xff]  ;;  %v609_v11 = vld [vmem:[%s1595_s3] sm:$0xff] }
  0x45   : > { %v418_v62 = vadd.f32 %v989_v61, %v401_v60  ;;  %654 = vmatpush.msra.mxu1 %v616_v4  ;;  %1032 = vmatpush.msra.mxu2 %v616_v4  ;;  %v612_v8 = vld [vmem:[%s1595_s3 + $0x18] sm:$0xff]  ;;  %v1439_v12 = vld [vmem:[%s1594_s2] ss:$0 sm:$0xff] }
  0x47   : > { %655 = vmatpush.msra.mxu1 %v615_v5  ;;  %1033 = vmatpush.msra.mxu2 %v615_v5 }
  0x49   : > { %995 = vmatmul.msk.f32.gmra.mxu0 %vm431_vm0, %v416_v46  ;;  %656 = vmatpush.msra.mxu1 %v614_v6 }
  0x4a   : > { %1000 = vmatmul.msk.f32.gmra.mxu3 %vm431_vm0, %v421_v49  ;;  %1034 = vmatpush.msra.mxu2 %v614_v6 }
  0x4b   : > { %657 = vmatpush.msra.mxu1 %v613_v7 }
  0x4c   : > { %1035 = vmatpush.msra.mxu2 %v613_v7 }
  0x4d   : > { %658 = vmatpush.msra.mxu1 %v612_v8 }
  0x4e   : > { %1036 = vmatpush.msra.mxu2 %v612_v8 }
  0x4f   : > { %659 = vmatpush.msra.mxu1 %v611_v9 }
  0x50   : > { %1037 = vmatpush.msra.mxu2 %v611_v9 }
  0x51   : > { %996 = vmatmul.msk.f32.gmra.mxu0 %vm431_vm0, %v417_v56  ;;  %660 = vmatpush.msra.mxu1 %v610_v10 }
  0x52   : > { %1001 = vmatmul.msk.f32.gmra.mxu3 %vm431_vm0, %v422_v59  ;;  %1038 = vmatpush.msra.mxu2 %v610_v10 }
  0x53   : > { %661 = vmatpush.msra.mxu1 %v609_v11 }
  0x54   : > { %1039 = vmatpush.msra.mxu2 %v609_v11 }
  0x59   : > { %997 = vmatmul.msk.f32.gmra.mxu0 %vm431_vm0, %v418_v62 }
  0x61   : > { %998 = vmatmul.msk.f32.gmra.mxu0 %vm431_vm0, %v419_v3 }
  0xbe   : > { %v473_v13 = vpop.f32.mrf.mxu0 }
  0xbf   : > { %v474_v14 = vadd.f32 %v1439_v12, %v473_v13 }
  0xc1   : > { %v505_v15 = vmin.f32 %v474_v14, 20.0  ;;  %vm497_vm3 = vcmp.gt.f32.partialorder %v474_v14, 20.0 }
  0xc3   : > { %v513_v16 = vmul.f32 1.442695, %v505_v15 }
  0xc5   : > { %1101 = vpow2.f32 %v513_v16  ;;  %v488_v26 = vpop.f32.mrf.mxu3 }
  0xc6   : > { %v476_v17 = vpop.f32.mrf.mxu0  ;;  %v1448_v34 = vadd.f32 %v1439_v12, %v488_v26 }
  0xc7   : > { %v477_v18 = vadd.f32 %v1439_v12, %v476_v17 }
  0xc8   : > { %v510_v43 = vmin.f32 %v1448_v34, 20.0  ;;  %vm502_vm13 = vcmp.gt.f32.partialorder %v1448_v34, 20.0 }
  0xc9   : > { %v506_v19 = vmin.f32 %v477_v18, 20.0  ;;  %vm498_vm5 = vcmp.gt.f32.partialorder %v477_v18, 20.0 }
  0xca   : > { %v523_v51 = vmul.f32 1.442695, %v510_v43 }
  0xcb   : > { %v1102_v20 = vpop.eup %1101  ;;  %v515_v21 = vmul.f32 1.442695, %v506_v19 }
  0xcc   : > { %v529_v22 = vadd.f32 1.0, %v1102_v20  ;;  %v532_v24 = vmul.f32 -0.5, %v1102_v20  ;;  %v535_v31 = vand.u32 2147483647, %v1102_v20 }
  0xcd   : > { %1103 = vpow2.f32 %v515_v21  ;;  %v491_v44 = vpop.f32.mrf.mxu3 }
  0xce   : > { %v479_v23 = vpop.f32.mrf.mxu0  ;;  %1105 = vlog2.f32 %v529_v22  ;;  %v533_v28 = vadd.f32 1.0, %v532_v24  ;;  %vm536_vm1 = vcmp.lt.f32.partialorder %v535_v31, 0.0004427343  ;;  %v1457_v56 = vadd.f32 %v1439_v12, %v491_v44 }
  0xcf   : > { %v1444_v25 = vadd.f32 %v1439_v12, %v479_v23 }
  0xd0   : > { %v534_v37 = vmul.f32 %v1102_v20, %v533_v28  ;;  %v511_v63 = vmin.f32 %v1457_v56, 20.0  ;;  %vm503_vm15 = vcmp.gt.f32.partialorder %v1457_v56, 20.0 }
  0xd1   : > { %v507_v27 = vmin.f32 %v1444_v25, 20.0  ;;  %vm499_vm7 = vcmp.gt.f32.partialorder %v1444_v25, 20.0 }
  0xd2   : > { %v525_v8 = vmul.f32 1.442695, %v511_v63 }
  0xd3   : > { %v1104_v29 = vpop.eup %1103  ;;  %v517_v30 = vmul.f32 1.442695, %v507_v27 }
  0xd4   : > { %v538_v32 = vadd.f32 1.0, %v1104_v29  ;;  %v1106_v33 = vpop.eup %1105  ;;  %v541_v38 = vmul.f32 -0.5, %v1104_v29  ;;  %v544_v48 = vand.u32 2147483647, %v1104_v29 }
  0xd5   : > { %1107 = vpow2.f32 %v517_v30  ;;  %v531_v36 = vmul.f32 0.6931472, %v1106_v33  ;;  %v494_v2 = vpop.f32.mrf.mxu3 }
  0xd6   : > { %v482_v35 = vpop.f32.mrf.mxu0  ;;  %1109 = vlog2.f32 %v538_v32  ;;  %v542_v45 = vadd.f32 1.0, %v541_v38  ;;  %vm545_vm4 = vcmp.lt.f32.partialorder %v544_v48, 0.0004427343  ;;  %v1466_v9 = vadd.f32 %v1439_v12, %v494_v2 }
  0xd7   : > { %v1451_v39 = vadd.f32 %v1439_v12, %v482_v35  ;;  %v537_v40 = vsel %vm536_vm1, %v534_v37, %v531_v36 }
  0xd8   : > { %v601_v42 = vsel %vm497_vm3, %v474_v14, %v537_v40  ;;  %v543_v54 = vmul.f32 %v1104_v29, %v542_v45  ;;  %v512_v17 = vmin.f32 %v1466_v9, 20.0  ;;  %vm504_vm1 = vcmp.gt.f32.partialorder %v1466_v9, 20.0 }
  0xd9   : > { %v508_v41 = vmin.f32 %v1451_v39, 20.0  ;;  %1002 = vmatmul.msk.f32.vlgmr.msra.gmra.mxu1 %vm621_vm2, %v601_v42  ;;  %vm500_vm9 = vcmp.gt.f32.partialorder %v1451_v39, 20.0 }
  0xda   : > { %v527_v23 = vmul.f32 1.442695, %v512_v17 }
  0xdb   : > { %v1108_v46 = vpop.eup %1107  ;;  %v519_v47 = vmul.f32 1.442695, %v508_v41 }
  0xdc   : > { %v547_v49 = vadd.f32 1.0, %v1108_v46  ;;  %v1110_v50 = vpop.eup %1109  ;;  %v550_v55 = vmul.f32 -0.5, %v1108_v46  ;;  %v553_v1 = vand.u32 2147483647, %v1108_v46 }
  0xdd   : > { %1111 = vpow2.f32 %v519_v47  ;;  %v540_v53 = vmul.f32 0.6931472, %v1110_v50 }
  0xde   : > { %v485_v52 = vpop.f32.mrf.mxu0  ;;  %1113 = vlog2.f32 %v547_v49  ;;  %v551_v61 = vadd.f32 1.0, %v550_v55  ;;  %vm554_vm6 = vcmp.lt.f32.partialorder %v553_v1, 0.0004427343 }
  0xdf   : > { %v1460_v57 = vadd.f32 %v1439_v12, %v485_v52  ;;  %v546_v58 = vsel %vm545_vm4, %v543_v54, %v540_v53  ;;  %1115 = vpow2.f32 %v523_v51 }
  0xe0   : > { %v602_v60 = vsel %vm498_vm5, %v477_v18, %v546_v58  ;;  %v552_v7 = vmul.f32 %v1108_v46, %v551_v61 }
  0xe1   : > { %v509_v59 = vmin.f32 %v1460_v57, 20.0  ;;  %1003 = vmatmul.msk.f32.gmra.mxu1 %vm621_vm2, %v602_v60  ;;  %vm501_vm11 = vcmp.gt.f32.partialorder %v1460_v57, 20.0 }
  0xe3   : > { %v1112_v62 = vpop.eup %1111  ;;  %v521_v0 = vmul.f32 1.442695, %v509_v59 }
  0xe4   : > { %v556_v3 = vadd.f32 1.0, %v1112_v62  ;;  %v1114_v4 = vpop.eup %1113  ;;  %v559_v5 = vmul.f32 -0.5, %v1112_v62  ;;  %v562_v15 = vand.u32 2147483647, %v1112_v62 }
  0xe5   : > { %1117 = vpow2.f32 %v521_v0  ;;  %v549_v6 = vmul.f32 0.6931472, %v1114_v4  ;;  %v1116_v11 = vpop.eup %1115 }
  0xe6   : > { %1119 = vlog2.f32 %v556_v3  ;;  %v560_v14 = vadd.f32 1.0, %v559_v5  ;;  %v574_v20 = vadd.f32 1.0, %v1116_v11  ;;  %vm563_vm8 = vcmp.lt.f32.partialorder %v562_v15, 0.0004427343 }
  0xe7   : > { %v555_v10 = vsel %vm554_vm6, %v552_v7, %v549_v6  ;;  %1121 = vpow2.f32 %v525_v8  ;;  %v577_v28 = vmul.f32 -0.5, %v1116_v11  ;;  %v580_v37 = vand.u32 2147483647, %v1116_v11 }
  0xe8   : > { %v603_v13 = vsel %vm499_vm7, %v1444_v25, %v555_v10  ;;  %v561_v21 = vmul.f32 %v1112_v62, %v560_v14  ;;  %v1490_v62 = vld [vmem:[%s1596_s4] ss:$0 sm:$0xff]  ;;  %v687_v15 = vlaneseq  ;;  %vm866_vm7 = vcmask 31744  }
  0xe9   : > { %1004 = vmatmul.msk.f32.gmra.mxu1 %vm621_vm2, %v603_v13  ;;  %v578_v35 = vadd.f32 1.0, %v577_v28  ;;  %vm581_vm12 = vcmp.lt.f32.partialorder %v580_v37, 0.0004427343 }
  0xeb   : > { %v1118_v16 = vpop.eup %1117  ;;  %v579_v42 = vmul.f32 %v1116_v11, %v578_v35 }
  0xec   : > { %v1120_v18 = vpop.eup %1119  ;;  %v565_v19 = vadd.f32 1.0, %v1118_v16  ;;  %v568_v22 = vmul.f32 -0.5, %v1118_v16  ;;  %v571_v29 = vand.u32 2147483647, %v1118_v16 }
  0xed   : > { %v558_v12 = vmul.f32 0.6931472, %v1120_v18  ;;  %v1122_v26 = vpop.eup %1121 }
  0xee   : > { %1123 = vlog2.f32 %v565_v19  ;;  %v569_v27 = vadd.f32 1.0, %v568_v22  ;;  %v583_v31 = vadd.f32 1.0, %v1122_v26  ;;  %vm572_vm10 = vcmp.lt.f32.partialorder %v571_v29, 0.0004427343 }
  0xef   : > { %v564_v24 = vsel %vm563_vm8, %v561_v21, %v558_v12  ;;  %1125 = vlog2.f32 %v574_v20  ;;  %v586_v43 = vmul.f32 -0.5, %v1122_v26  ;;  %v589_v48 = vand.u32 2147483647, %v1122_v26 }
  0xf0   : > { %v604_v25 = vsel %vm500_vm9, %v1451_v39, %v564_v24  ;;  %1127 = vpow2.f32 %v527_v23  ;;  %v570_v33 = vmul.f32 %v1118_v16, %v569_v27  ;;  %v1508_v24 = vand.u32 127, %v687_v15 }
  0xf1   : > { %1005 = vmatmul.msk.f32.gmra.mxu1 %vm621_vm2, %v604_v25  ;;  %1129 = vlog2.f32 %v583_v31  ;;  %v587_v46 = vadd.f32 1.0, %v586_v43  ;;  %vm590_vm14 = vcmp.lt.f32.partialorder %v589_v48, 0.0004427343 }
  0xf2   : > { %vm857_vm6 = vcmp.eq.s32.totalorder %v1508_v24, 0 }
  0xf3   : > { %v588_v51 = vmul.f32 %v1122_v26, %v587_v46 }
  0xf4   : > { %v1124_v30 = vpop.eup %1123 }
  0xf5   : > { %v567_v32 = vmul.f32 0.6931472, %v1124_v30  ;;  %v1126_v36 = vpop.eup %1125 }
  0xf6   : > { %v1128_v40 = vpop.eup %1127  ;;  %v576_v41 = vmul.f32 0.6931472, %v1126_v36 }
  0xf7   : > { %v573_v38 = vsel %vm572_vm10, %v570_v33, %v567_v32  ;;  %v592_v44 = vadd.f32 1.0, %v1128_v40  ;;  %v1130_v47 = vpop.eup %1129  ;;  %v595_v52 = vmul.f32 -0.5, %v1128_v40 }
  0xf8   : > { %v605_v39 = vsel %vm501_vm11, %v1460_v57, %v573_v38  ;;  %v582_v45 = vsel %vm581_vm12, %v579_v42, %v576_v41  ;;  %v585_v50 = vmul.f32 0.6931472, %v1130_v47  ;;  %v598_v57 = vand.u32 2147483647, %v1128_v40 }
  0xf9   : > { %1006 = vmatmul.msk.f32.vlgmr.msra.gmra.mxu2 %vm621_vm2, %v605_v39  ;;  %v606_v49 = vsel %vm502_vm13, %v1448_v34, %v582_v45  ;;  %1131 = vlog2.f32 %v592_v44  ;;  %v596_v54 = vadd.f32 1.0, %v595_v52 }
  0xfa   : > { %v591_v53 = vsel %vm590_vm14, %v588_v51, %v585_v50  ;;  %vm599_vm0 = vcmp.lt.f32.partialorder %v598_v57, 0.0004427343 }
  0xfb   : > { %v607_v58 = vsel %vm503_vm15, %v1457_v56, %v591_v53  ;;  %v597_v60 = vmul.f32 %v1128_v40, %v596_v54 }
  0xff   : > { %v1132_v55 = vpop.eup %1131 }
 0x100   : > { %v594_v59 = vmul.f32 0.6931472, %v1132_v55 }
 0x101   : > { %1007 = vmatmul.msk.f32.gmra.mxu2 %vm621_vm2, %v606_v49 }
 0x102   : > { %v600_v34 = vsel %vm599_vm0, %v597_v60, %v594_v59 }
 0x103   : > { %v608_v61 = vsel %vm504_vm1, %v1466_v9, %v600_v34 }
 0x109   : > { %1008 = vmatmul.msk.f32.gmra.mxu2 %vm621_vm2, %v607_v58 }
 0x111   : > { %1009 = vmatmul.msk.f32.gmra.mxu2 %vm621_vm2, %v608_v61 }
 0x156   : > { %v663_v56 = vpop.f32.mrf.mxu1 }
 0x157   : > { %v664_v63 = vadd.f32 %v1490_v62, %v663_v56 }
 0x159   : > { %v1010_v0 = vmul.f32 -1.442695, %v664_v63 }
 0x15b   : > { %1133 = vpow2.f32 %v1010_v0 }
 0x15e   : > { %v666_v1 = vpop.f32.mrf.mxu1 }
 0x15f   : > { %v1494_v2 = vadd.f32 %v1490_v62, %v666_v1 }
 0x161   : > { %v1134_v3 = vpop.eup %1133  ;;  %v1011_v4 = vmul.f32 -1.442695, %v1494_v2 }
 0x162   : > { %v713_v5 = vadd.f32 1.0, %v1134_v3 }
 0x163   : > { %1135 = vpow2.f32 %v1011_v4 }
 0x164   : > { %1137 = vrcp.f32 %v713_v5  ;;  %v732_v16 = vand.u32 2147483648, %v713_v5  ;;  %v730_v19 = vand.u32 2147483647, %v713_v5  ;;  %vm726_vm3 = vweird.f32 %v713_v5 }
 0x166   : > { %v669_v6 = vpop.f32.mrf.mxu1  ;;  %v733_v25 = vor.u32 1.1754944e-38, %v732_v16  ;;  %vm731_vm5 = vcmp.eq.f32.partialorder %v730_v19, 8.507059e+37 }
 0x167   : > { %v1500_v7 = vadd.f32 %v1490_v62, %v669_v6 }
 0x169   : > { %v1136_v8 = vpop.eup %1135  ;;  %v1012_v9 = vmul.f32 -1.442695, %v1500_v7 }
 0x16a   : > { %v1138_v10 = vpop.eup %1137  ;;  %v714_v11 = vadd.f32 1.0, %v1136_v8 }
 0x16b   : > { %v722_v13 = vmul.f32 %v1138_v10, %v713_v5  ;;  %1139 = vpow2.f32 %v1012_v9  ;;  %vm727_vm2 = vweird.f32 %v1138_v10 }
 0x16c   : > { %1141 = vrcp.f32 %v714_v11  ;;  %vm728_vm4 = vmor %vm726_vm3, %vm727_vm2  ;;  %v747_v32 = vand.u32 2147483648, %v714_v11  ;;  %v745_v36 = vand.u32 2147483647, %v714_v11  ;;  %vm741_vm9 = vweird.f32 %v714_v11 }
 0x16d   : > { %v723_v14 = vsub.f32 1.0, %v722_v13 }
 0x16e   : > { %v672_v17 = vpop.f32.mrf.mxu1  ;;  %v748_v41 = vor.u32 1.1754944e-38, %v747_v32  ;;  %vm746_vm11 = vcmp.eq.f32.partialorder %v745_v36, 8.507059e+37 }
 0x16f   : > { %v724_v18 = vmul.f32 %v1138_v10, %v723_v14  ;;  %v1505_v20 = vadd.f32 %v1490_v62, %v672_v17 }
 0x171   : > { %v1140_v12 = vpop.eup %1139  ;;  %v725_v21 = vadd.f32 %v1138_v10, %v724_v18  ;;  %v1013_v22 = vmul.f32 -1.442695, %v1505_v20 }
 0x172   : > { %v1142_v23 = vpop.eup %1141  ;;  %v715_v26 = vadd.f32 1.0, %v1140_v12 }
 0x173   : > { %v729_v27 = vsel %vm728_vm4, %v1138_v10, %v725_v21  ;;  %v737_v28 = vmul.f32 %v1142_v23, %v714_v11  ;;  %1143 = vpow2.f32 %v1013_v22  ;;  %vm742_vm8 = vweird.f32 %v1142_v23 }
 0x174   : > { %v734_v29 = vsel %vm731_vm5, %v733_v25, %v729_v27  ;;  %1145 = vrcp.f32 %v715_v26  ;;  %vm743_vm10 = vmor %vm741_vm9, %vm742_vm8  ;;  %v760_v50 = vand.u32 2147483647, %v715_v26  ;;  %v762_v51 = vand.u32 2147483648, %v715_v26 }
 0x175   : > { %v841_v30 = vmul.f32 1.002, %v734_v29  ;;  %v738_v31 = vsub.f32 1.0, %v737_v28  ;;  %vm756_vm13 = vweird.f32 %v715_v26 }
 0x176   : > { %v763_v59 = vor.u32 1.1754944e-38, %v762_v51  ;;  %vm761_vm15 = vcmp.eq.f32.partialorder %v760_v50, 8.507059e+37 }
 0x177   : > { %v1018_v33 = vadd.f32 -0.001, %v841_v30  ;;  %v739_v35 = vmul.f32 %v1142_v23, %v738_v31 }
 0x179   : > { %v1144_v37 = vpop.eup %1143  ;;  %v858_v38 = vsel %vm857_vm6, %v664_v63, %v1018_v33  ;;  %v740_v39 = vadd.f32 %v1142_v23, %v739_v35 }
 0x17a   : > { %v1146_v40 = vpop.eup %1145  ;;  %867 = vst.msk [vmem:[%s1514_s29] sm:$0xff] %vm866_vm7, %v858_v38  ;;  %v716_v42 = vadd.f32 1.0, %v1144_v37 }
 0x17b   : > { %v744_v43 = vsel %vm743_vm10, %v1142_v23, %v740_v39  ;;  %v752_v44 = vmul.f32 %v1146_v40, %v715_v26  ;;  %vm757_vm12 = vweird.f32 %v1146_v40 }
 0x17c   : > { %v675_v45 = vpop.f32.mrf.mxu2  ;;  %v749_v46 = vsel %vm746_vm11, %v748_v41, %v744_v43  ;;  %1147 = vrcp.f32 %v716_v42  ;;  %vm758_vm14 = vmor %vm756_vm13, %vm757_vm12  ;;  %v775_v8 = vand.u32 2147483647, %v716_v42  ;;  %vm771_vm1 = vweird.f32 %v716_v42 }
 0x17d   : > { %v842_v47 = vmul.f32 1.002, %v749_v46  ;;  %v753_v48 = vsub.f32 1.0, %v752_v44  ;;  %v1521_v49 = vadd.f32 %v1490_v62, %v675_v45 }
 0x17e   : > { %vm776_vm3 = vcmp.eq.f32.partialorder %v775_v8, 8.507059e+37 }
 0x17f   : > { %v1019_v52 = vadd.f32 -0.001, %v842_v47  ;;  %v754_v53 = vmul.f32 %v1146_v40, %v753_v48  ;;  %v1014_v54 = vmul.f32 -1.442695, %v1521_v49 }
 0x181   : > { %v859_v55 = vsel %vm857_vm6, %v1494_v2, %v1019_v52  ;;  %v755_v57 = vadd.f32 %v1146_v40, %v754_v53  ;;  %1149 = vpow2.f32 %v1014_v54  ;;  %v777_v2 = vand.u32 2147483648, %v716_v42 }
 0x182   : > { %v1148_v58 = vpop.eup %1147  ;;  %868 = vst.msk [vmem:[%s1514_s29 + $0x8] sm:$0xff] %vm866_vm7, %v859_v55 }
 0x183   : > { %v759_v60 = vsel %vm758_vm14, %v1146_v40, %v755_v57  ;;  %v767_v34 = vmul.f32 %v1148_v58, %v716_v42  ;;  %vm772_vm0 = vweird.f32 %v1148_v58  ;;  %v778_v13 = vor.u32 1.1754944e-38, %v777_v2 }
 0x184   : > { %v678_v61 = vpop.f32.mrf.mxu2  ;;  %v764_v56 = vsel %vm761_vm15, %v763_v59, %v759_v60  ;;  %vm773_vm2 = vmor %vm771_vm1, %vm772_vm0 }
 0x185   : > { %v1530_v63 = vadd.f32 %v1490_v62, %v678_v61  ;;  %v843_v0 = vmul.f32 1.002, %v764_v56  ;;  %v768_v1 = vsub.f32 1.0, %v767_v34 }
 0x187   : > { %v1015_v3 = vmul.f32 -1.442695, %v1530_v63  ;;  %v1150_v4 = vpop.eup %1149  ;;  %v1020_v5 = vadd.f32 -0.001, %v843_v0  ;;  %v769_v6 = vmul.f32 %v1148_v58, %v768_v1 }
 0x188   : > { %v717_v9 = vadd.f32 1.0, %v1150_v4 }
 0x189   : > { %1151 = vpow2.f32 %v1015_v3  ;;  %v860_v10 = vsel %vm857_vm6, %v1500_v7, %v1020_v5  ;;  %v770_v11 = vadd.f32 %v1148_v58, %v769_v6 }
 0x18a   : > { %869 = vst.msk [vmem:[%s1514_s29 + $0x10] sm:$0xff] %vm866_vm7, %v860_v10  ;;  %1153 = vrcp.f32 %v717_v9  ;;  %v792_v28 = vand.u32 2147483648, %v717_v9  ;;  %v790_v31 = vand.u32 2147483647, %v717_v9  ;;  %vm786_vm5 = vweird.f32 %v717_v9 }
 0x18b   : > { %v774_v14 = vsel %vm773_vm2, %v1148_v58, %v770_v11 }
 0x18c   : > { %v681_v15 = vpop.f32.mrf.mxu2  ;;  %v779_v16 = vsel %vm776_vm3, %v778_v13, %v774_v14  ;;  %v793_v37 = vor.u32 1.1754944e-38, %v792_v28  ;;  %vm791_vm9 = vcmp.eq.f32.partialorder %v790_v31, 8.507059e+37 }
 0x18d   : > { %v1539_v17 = vadd.f32 %v1490_v62, %v681_v15  ;;  %v844_v18 = vmul.f32 1.002, %v779_v16 }
 0x18f   : > { %v1152_v19 = vpop.eup %1151  ;;  %v1016_v12 = vmul.f32 -1.442695, %v1539_v17  ;;  %v1021_v7 = vadd.f32 -0.001, %v844_v18 }
 0x190   : > { %v718_v21 = vadd.f32 1.0, %v1152_v19  ;;  %v1154_v22 = vpop.eup %1153 }
 0x191   : > { %1155 = vpow2.f32 %v1016_v12  ;;  %v861_v23 = vsel %vm857_vm6, %v1505_v20, %v1021_v7  ;;  %v782_v25 = vmul.f32 %v1154_v22, %v717_v9  ;;  %vm787_vm4 = vweird.f32 %v1154_v22 }
 0x192   : > { %1157 = vrcp.f32 %v718_v21  ;;  %870 = vst.msk [vmem:[%s1514_s29 + $0x18] sm:$0xff] %vm866_vm7, %v861_v23  ;;  %vm788_vm8 = vmor %vm786_vm5, %vm787_vm4  ;;  %v807_v42 = vand.u32 2147483648, %v718_v21  ;;  %v805_v44 = vand.u32 2147483647, %v718_v21  ;;  %vm801_vm11 = vweird.f32 %v718_v21 }
 0x193   : > { %v783_v26 = vsub.f32 1.0, %v782_v25 }
 0x194   : > { %v684_v27 = vpop.f32.mrf.mxu2  ;;  %v808_v51 = vor.u32 1.1754944e-38, %v807_v42  ;;  %vm806_vm13 = vcmp.eq.f32.partialorder %v805_v44, 8.507059e+37 }
 0x195   : > { %v1548_v29 = vadd.f32 %v1490_v62, %v684_v27  ;;  %v784_v30 = vmul.f32 %v1154_v22, %v783_v26 }
 0x197   : > { %v1156_v32 = vpop.eup %1155  ;;  %v1017_v33 = vmul.f32 -1.442695, %v1548_v29  ;;  %v785_v36 = vadd.f32 %v1154_v22, %v784_v30 }
 0x198   : > { %v1158_v35 = vpop.eup %1157  ;;  %v719_v20 = vadd.f32 1.0, %v1156_v32 }
 0x199   : > { %v797_v38 = vmul.f32 %v1158_v35, %v718_v21  ;;  %1159 = vpow2.f32 %v1017_v33  ;;  %v789_v39 = vsel %vm788_vm8, %v1154_v22, %v785_v36  ;;  %vm802_vm10 = vweird.f32 %v1158_v35 }
 0x19a   : > { %1161 = vrcp.f32 %v719_v20  ;;  %v794_v40 = vsel %vm791_vm9, %v793_v37, %v789_v39  ;;  %vm803_vm12 = vmor %vm801_vm11, %vm802_vm10  ;;  %v822_v59 = vand.u32 2147483648, %v719_v20  ;;  %v820_v61 = vand.u32 2147483647, %v719_v20 }
 0x19b   : > { %v798_v62 = vsub.f32 1.0, %v797_v38  ;;  %v845_v41 = vmul.f32 1.002, %v794_v40  ;;  %vm816_vm15 = vweird.f32 %v719_v20 }
 0x19c   : > { %v823_v1 = vor.u32 1.1754944e-38, %v822_v59  ;;  %vm821_vm1 = vcmp.eq.f32.partialorder %v820_v61, 8.507059e+37 }
 0x19d   : > { %v799_v43 = vmul.f32 %v1158_v35, %v798_v62  ;;  %v1022_v45 = vadd.f32 -0.001, %v845_v41 }
 0x19f   : > { %v1160_v46 = vpop.eup %1159  ;;  %v800_v47 = vadd.f32 %v1158_v35, %v799_v43  ;;  %v862_v50 = vsel %vm857_vm6, %v1521_v49, %v1022_v45 }
 0x1a0   : > { %v1162_v48 = vpop.eup %1161  ;;  %v720_v52 = vadd.f32 1.0, %v1160_v46  ;;  %871 = vst.msk [vmem:[%s1514_s29 + $0x20] sm:$0xff] %vm866_vm7, %v862_v50 }
 0x1a1   : > { %v804_v53 = vsel %vm803_vm12, %v1158_v35, %v800_v47  ;;  %v812_v54 = vmul.f32 %v1162_v48, %v719_v20  ;;  %vm817_vm14 = vweird.f32 %v1162_v48 }
 0x1a2   : > { %v809_v55 = vsel %vm806_vm13, %v808_v51, %v804_v53  ;;  %1163 = vrcp.f32 %v720_v52  ;;  %vm818_vm0 = vmor %vm816_vm15, %vm817_vm14  ;;  %v837_v8 = vand.u32 2147483648, %v720_v52  ;;  %vm831_vm3 = vweird.f32 %v720_v52 }
 0x1a3   : > { %v846_v57 = vmul.f32 1.002, %v809_v55  ;;  %v813_v58 = vsub.f32 1.0, %v812_v54 }
 0x1a4   : > { %v838_v14 = vor.u32 1.1754944e-38, %v837_v8 }
 0x1a5   : > { %v1023_v60 = vadd.f32 -0.001, %v846_v57  ;;  %v814_v34 = vmul.f32 %v1162_v48, %v813_v58 }
 0x1a7   : > { %v863_v49 = vsel %vm857_vm6, %v1530_v63, %v1023_v60  ;;  %v815_v56 = vadd.f32 %v1162_v48, %v814_v34  ;;  %v835_v63 = vand.u32 2147483647, %v720_v52 }
 0x1a8   : > { %v1164_v0 = vpop.eup %1163  ;;  %872 = vst.msk [vmem:[%s1514_s29 + $0x28] sm:$0xff] %vm866_vm7, %v863_v49 }
 0x1a9   : > { %v819_v2 = vsel %vm818_vm0, %v1162_v48, %v815_v56  ;;  %v827_v3 = vmul.f32 %v1164_v0, %v720_v52  ;;  %vm832_vm2 = vweird.f32 %v1164_v0  ;;  %vm836_vm5 = vcmp.eq.f32.partialorder %v835_v63, 8.507059e+37 }
 0x1aa   : > { %v824_v4 = vsel %vm821_vm1, %v823_v1, %v819_v2  ;;  %vm833_vm4 = vmor %vm831_vm3, %vm832_vm2 }
 0x1ab   : > { %v847_v5 = vmul.f32 1.002, %v824_v4  ;;  %v828_v6 = vsub.f32 1.0, %v827_v3 }
 0x1ad   : > { %v1024_v9 = vadd.f32 -0.001, %v847_v5  ;;  %v829_v10 = vmul.f32 %v1164_v0, %v828_v6 }
 0x1af   : > { %v864_v11 = vsel %vm857_vm6, %v1539_v17, %v1024_v9  ;;  %v830_v13 = vadd.f32 %v1164_v0, %v829_v10 }
 0x1b0   : > { %873 = vst.msk [vmem:[%s1514_s29 + $0x30] sm:$0xff] %vm866_vm7, %v864_v11 }
 0x1b1   : > { %v834_v15 = vsel %vm833_vm4, %v1164_v0, %v830_v13 }
 0x1b2   : > { %v839_v16 = vsel %vm836_vm5, %v838_v14, %v834_v15 }
 0x1b3   : > { %v848_v18 = vmul.f32 1.002, %v839_v16 }
 0x1b5   : > { %v1025_v19 = vadd.f32 -0.001, %v848_v18 }
 0x1b7   : > { %v865_v12 = vsel %vm857_vm6, %v1548_v29, %v1025_v19 }
 0x1b8   : > { %874 = vst.msk [vmem:[%s1514_s29 + $0x38] sm:$0xff] %vm866_vm7, %v865_v12 }
 0x1b9 PF: > { %s15_s24 = sadd.s32 1, %s1219_s24   ;;  %s1598_s18 = smov %s1199_s19 }
 0x1ba   : > { %p12_p12 = scmp.ge.s32.totalorder %s15_s24, 10   ;;  %s1599_s19 = smov %s1302_s6 }
 0x1bb   : > { %s1600_s20 = smov %s1211_s22  ;;  %s1601_s21 = smov %s1215_s23 }
 0x1bc   : > { %s1602_s22 = smov %s1605_s25  ;;  %s1603_s23 = smov %s1609_s26 }
 0x1bd   :  { %14 = sbr.rel (!%p12_p12) target bundleno = 4 (0x4), region = 115 }

</bundles_post_ra>
